<compile_context>
chip_gen: v7x
topology: tpu7x:2x2x1
jax: 0.10.0
libtpu: 0.0.40
codegen_flags: <defaults>
</compile_context>

<pallas_src>
import functools

import jax
import jax.numpy as jnp
from jax.experimental import pallas as pl
from jax.experimental.pallas import tpu as pltpu


# ----------------------------- small helpers --------------------------------

def _round_up(x, m):
    return ((x + m - 1) // m) * m


def _pad2(a, rows, cols):
    return jnp.pad(a, ((0, rows - a.shape[0]), (0, cols - a.shape[1])))


def _pow2_tile(pref, n):
    """Largest power-of-two multiple of 128 that is <= min(pref, n)."""
    t = 128
    while t * 2 <= min(pref, n):
        t *= 2
    return t


def _select_tiles(n, tm_pref=512, tk_pref=1024, max_pad_frac=0.25):
    """Pick (np_, tm, tk): big tiles, pad N up (bounded), >=2 row tiles if possible."""
    np_128 = _round_up(max(int(n), 1), 128)
    tm = _pow2_tile(tm_pref, np_128)
    # don't let row-tile padding blow up the O(N^2) A pass
    while tm > 128 and (_round_up(np_128, tm) - np_128) > max_pad_frac * np_128:
        tm //= 2
    # keep >= 2 row tiles so both v7x TensorCores get work (when the graph allows)
    while tm > 128 and (np_128 + tm - 1) // tm < 2:
        tm //= 2
    np_ = _round_up(np_128, tm)
    # tk only has to divide np_; pick the largest multiple-of-128 divisor <= tk_pref
    tk = 128
    for cand in range(128, min(tk_pref, np_) + 1, 128):
        if np_ % cand == 0:
            tk = cand
    return np_, tm, tk


# VMEM budgeting ---------------------------------------------------------------

_RESIDENT_V_VMEM_CAP = 44 * 2**20   # keep well under v7x's 64 MiB physical VMEM


def _a_pass_vmem_bytes(np_, hp, tm, tk, resident, out_itemsize):
    v_block = (np_ if resident else tk) * hp * 2
    return (2 * tm * tk * 2            # A tiles (bf16), double-buffered
            + 2 * v_block              # streamed/resident operand (bf16)
            + 2 * tm * hp * 2          # xb tile (bf16)
            + 2 * 2 * hp * hp * 2      # wta + wpost (bf16), double-buffered
            + 2 * tm * hp * out_itemsize
            + tm * hp * 4)             # f32 accumulator scratch


def _vmem_limit_bytes(estimate):
    # explicit scoped-VMEM limit: headroom over the estimate, capped under v7x's
    # 64 MiB physical VMEM (also >= the v5e 16 MiB / v6e 32 MiB defaults).
    return int(min(max(int(1.5 * estimate), 32 * 2**20), 56 * 2**20))


# ------------------------------- kernels ------------------------------------

def _x_prepass_kernel(x_ref, wcat_ref, xw0_ref, xb0_ref, xb1_ref):
    # One wide bf16 matmul X_tile @ [W0 | Wt0b | Wt1b] amortizes the tiny-K (=F) pass.
    xcat = jnp.dot(x_ref[...], wcat_ref[...], preferred_element_type=jnp.float32)
    hp = xw0_ref.shape[-1]
    xw0_ref[...] = xcat[:, :hp].astype(xw0_ref.dtype)
    xb0_ref[...] = xcat[:, hp:2 * hp].astype(xb0_ref.dtype)
    xb1_ref[...] = xcat[:, 2 * hp:].astype(xb1_ref.dtype)


def _a_pass_kernel(a_ref, v_ref, xb_ref, wta_ref, *rest, apply_post, resident, tk):
    if apply_post:
        wpost_ref, out_ref, acc_ref = rest
    else:
        out_ref, acc_ref = rest

    k = pl.program_id(1)

    @pl.when(k == 0)
    def _():
        acc_ref[...] = jnp.zeros_like(acc_ref)

    if resident:
        # V is fully VMEM-resident (fetched once per pallas_call); slice the
        # current reduction chunk out of it.
        start = pl.multiple_of(k * tk, 128)
        v = v_ref[pl.ds(start, tk), :]
    else:
        v = v_ref[...]

    # bf16 operands, f32 accumulation on the MXU.
    acc_ref[...] += jnp.dot(a_ref[...], v, preferred_element_type=jnp.float32)

    @pl.when(k == pl.num_programs(1) - 1)
    def _():
        # Fused epilogue on the resident row tile: (gc @ Wta + X @ Wtb), ReLU.
        # bf16 MXU operands (full-rate), f32 accumulation / add.
        h = jnp.dot(acc_ref[...].astype(jnp.bfloat16), wta_ref[...],
                    preferred_element_type=jnp.float32)
        h = jnp.maximum(h + xb_ref[...].astype(jnp.float32), 0.0)
        if apply_post:
            # Pre-apply next graph-conv weight so stage 2 is a pure A @ (.) stream.
            h = jnp.dot(h.astype(jnp.bfloat16), wpost_ref[...],
                        preferred_element_type=jnp.float32)
        out_ref[...] = h.astype(out_ref.dtype)


# ----------------------------- pallas_call wrappers --------------------------

def _x_prepass(x_bf, wcat_bf, hp, tm):
    np_, fp = x_bf.shape
    row = lambda i: (i, 0)
    vmem_est = (2 * tm * fp * 2            # x tile (bf16)
                + 2 * fp * 3 * hp * 2      # wcat (bf16), double-buffered
                + 3 * 2 * tm * hp * 2)     # three bf16 outputs
    return pl.pallas_call(
        _x_prepass_kernel,
        out_shape=(jax.ShapeDtypeStruct((np_, hp), jnp.bfloat16),
                   jax.ShapeDtypeStruct((np_, hp), jnp.bfloat16),
                   jax.ShapeDtypeStruct((np_, hp), jnp.bfloat16)),
        grid_spec=pltpu.PrefetchScalarGridSpec(
            num_scalar_prefetch=0,
            grid=(np_ // tm,),
            in_specs=[pl.BlockSpec((tm, fp), row),
                      pl.BlockSpec((fp, 3 * hp), lambda i: (0, 0))],
            out_specs=(pl.BlockSpec((tm, hp), row),
                       pl.BlockSpec((tm, hp), row),
                       pl.BlockSpec((tm, hp), row)),
        ),
        compiler_params=pltpu.CompilerParams(
            dimension_semantics=("parallel",),
            vmem_limit_bytes=_vmem_limit_bytes(vmem_est)),
    )(x_bf, wcat_bf)


def _a_pass(a_bf, v_bf, xb_bf, wta_bf, wpost_bf, out_dtype, *, tm, tk, resident):
    np_ = a_bf.shape[0]
    hp = v_bf.shape[1]
    kt = np_ // tk

    if resident:
        # Constant index_map + full block: DMA'd once, kept VMEM-resident.
        v_spec = pl.BlockSpec((np_, hp), lambda i, k: (0, 0))
    else:
        v_spec = pl.BlockSpec((tk, hp), lambda i, k: (k, 0))

    in_specs = [
        # TODO(synk): sweep pipeline_mode=pl.Buffered(3) on this spec if the
        # profile shows exposed DMA at k-boundaries with large tiles.
        pl.BlockSpec((tm, tk), lambda i, k: (i, k)),   # A tile (streamed, bf16)
        v_spec,                                        # activation operand (bf16)
        pl.BlockSpec((tm, hp), lambda i, k: (i, 0)),   # epilogue additive term (bf16)
        pl.BlockSpec((hp, hp), lambda i, k: (0, 0)),   # resident weight Wta (bf16)
    ]
    args = [a_bf, v_bf, xb_bf, wta_bf]
    if wpost_bf is not None:
        in_specs.append(pl.BlockSpec((hp, hp), lambda i, k: (0, 0)))
        args.append(wpost_bf)

    out_itemsize = jnp.dtype(out_dtype).itemsize
    n_epi = 2 if wpost_bf is not None else 1
    flops = 2 * np_ * np_ * hp + n_epi * 2 * np_ * hp * hp
    v_reads = 1 if resident else (np_ // tm)
    bytes_accessed = (a_bf.size * a_bf.dtype.itemsize
                      + v_reads * v_bf.size * v_bf.dtype.itemsize
                      + xb_bf.size * xb_bf.dtype.itemsize
                      + 2 * hp * hp * 2
                      + np_ * hp * out_itemsize)

    vmem_est = _a_pass_vmem_bytes(np_, hp, tm, tk, resident, out_itemsize)

    return pl.pallas_call(
        functools.partial(_a_pass_kernel, apply_post=wpost_bf is not None,
                          resident=resident, tk=tk),
        out_shape=jax.ShapeDtypeStruct((np_, hp), out_dtype),
        grid_spec=pltpu.PrefetchScalarGridSpec(
            num_scalar_prefetch=0,
            grid=(np_ // tm, kt),                      # reduction (A cols) last
            in_specs=in_specs,
            out_specs=pl.BlockSpec((tm, hp), lambda i, k: (i, 0)),
            scratch_shapes=[pltpu.VMEM((tm, hp), jnp.float32)],
        ),
        compiler_params=pltpu.CompilerParams(
            dimension_semantics=("parallel", "arbitrary"),
            vmem_limit_bytes=_vmem_limit_bytes(vmem_est)),
        cost_estimate=pl.CostEstimate(flops=int(flops), transcendentals=0,
                                      bytes_accessed=int(bytes_accessed)),
    )(*args)


# ------------------------------ public forward -------------------------------

def hier_global_gcn(x, adj, params, *, tm=512, tk=1024):
    """Eval-mode HierGlobalGCN forward.  x: (N, F) f32, adj: (N, N) f32 (dense)."""
    N, F = x.shape
    H = params["w0"].shape[1]

    fp = _round_up(F, 128)
    hp = _round_up(H, 128)
    np_, tm, tk = _select_tiles(N, tm_pref=tm, tk_pref=tk)

    bf16 = jnp.bfloat16
    # Host-side zero padding to lane/MXU-friendly shapes (numerically exact).
    # adj is cast to bf16 BEFORE padding: no padded f32 N^2 intermediate.
    x_bf = _pad2(x.astype(bf16), np_, fp)
    a_bf = _pad2(adj.astype(bf16), np_, np_)

    w0_p = _pad2(params["w0"], fp, hp)
    wt0b_p = _pad2(params["wt0b"], fp, hp)
    wt1b_p = _pad2(params["wt1b"], fp, hp)
    wcat_bf = jnp.concatenate([w0_p, wt0b_p, wt1b_p], axis=1).astype(bf16)  # (fp, 3*hp)
    wt0a_bf = _pad2(params["wt0a"], hp, hp).astype(bf16)
    wt1a_bf = _pad2(params["wt1a"], hp, hp).astype(bf16)
    w1_bf = _pad2(params["w1"], hp, hp).astype(bf16)

    # Keep the streamed activation operand fully VMEM-resident when it fits.
    resident = _a_pass_vmem_bytes(np_, hp, tm, tk, True, 4) <= _RESIDENT_V_VMEM_CAP

    # stage 0: fused X-side matmul  -> XW0, XB0, XB1 (all bf16)
    xw0_bf, xb0_bf, xb1_bf = _x_prepass(x_bf, wcat_bf, hp, tm)
    # stage 1: gc0 = A @ XW0 ; h1 = relu(gc0 @ Wt0a + XB0) ; HW1 = h1 @ W1
    hw1_bf = _a_pass(a_bf, xw0_bf, xb0_bf, wt0a_bf, w1_bf, jnp.bfloat16,
                     tm=tm, tk=tk, resident=resident)
    # stage 2: gc1 = A @ HW1 ; h2 = relu(gc1 @ Wt1a + XB1)
    h2_p = _a_pass(a_bf, hw1_bf, xb1_bf, wt1a_bf, None, jnp.float32,
                   tm=tm, tk=tk, resident=resident)

    return h2_p[:N, :H]


# ------------------------------ params & refs --------------------------------

def init_params(num_features, hidden=200, seed=0):
    """Deterministic parameter init mirroring module shapes (bias=False)."""
    key = jax.random.PRNGKey(seed)
    k0, k1, k2, k3 = jax.random.split(key, 4)
    F, H = num_features, hidden

    def uni(k, shape, fan_in):
        bound = 1.0 / jnp.sqrt(jnp.float32(fan_in))
        return jax.random.uniform(k, shape, jnp.float32, -bound, bound)

    w0 = uni(k0, (F, H), F)                 # gc_input weight   (in, out)
    w1 = uni(k1, (H, H), H)                 # gc_hidden1 weight (in, out)
    wt0 = uni(k2, (H + F, H), H + F)        # trans_h.weight.T  (in, out)
    wt1 = uni(k3, (H + F, H), H + F)        # trans_h1.weight.T (in, out)
    return {
        "w0": w0,
        "w1": w1,
        "wt0a": wt0[:H, :], "wt0b": wt0[H:, :],
        "wt1a": wt1[:H, :], "wt1b": wt1[H:, :],
    }


def reference_f32(x, adj, p):
    gc0 = adj @ (x @ p["w0"])
    h1 = jnp.maximum(gc0 @ p["wt0a"] + x @ p["wt0b"], 0.0)
    gc1 = adj @ (h1 @ p["w1"])
    h2 = jnp.maximum(gc1 @ p["wt1a"] + x @ p["wt1b"], 0.0)
    return h2


def reference_mixed(x, adj, p):
    """Pure-JAX reference with the same bf16-operand / f32-accum policy as the kernel."""
    f32, bf16 = jnp.float32, jnp.bfloat16
    x_bf = x.astype(bf16)
    xw0 = jnp.dot(x_bf, p["w0"].astype(bf16), preferred_element_type=f32).astype(bf16)
    xb0 = jnp.dot(x_bf, p["wt0b"].astype(bf16), preferred_element_type=f32).astype(bf16)
    xb1 = jnp.dot(x_bf, p["wt1b"].astype(bf16), preferred_element_type=f32).astype(bf16)
    a_bf = adj.astype(bf16)
    gc0 = jnp.dot(a_bf, xw0, preferred_element_type=f32)
    h1 = jnp.maximum(
        jnp.dot(gc0.astype(bf16), p["wt0a"].astype(bf16), preferred_element_type=f32)
        + xb0.astype(f32), 0.0)
    hw1 = jnp.dot(h1.astype(bf16), p["w1"].astype(bf16),
                  preferred_element_type=f32).astype(bf16)
    gc1 = jnp.dot(a_bf, hw1, preferred_element_type=f32)
    h2 = jnp.maximum(
        jnp.dot(gc1.astype(bf16), p["wt1a"].astype(bf16), preferred_element_type=f32)
        + xb1.astype(f32), 0.0)
    return h2


# --------------------------------- demo --------------------------------------

if __name__ == "__main__":
    N, F = 16, 32  # small: 16 graph nodes, 32 input features; hidden fixed at 200
    key = jax.random.PRNGKey(0)
    kx, ka = jax.random.split(key)

    x = jax.random.normal(kx, (N, F), jnp.float32)
    # symmetric, row-normalized dense adjacency (stand-in for torch.sparse adj)
    a_raw = (jax.random.uniform(ka, (N, N)) > 0.7).astype(jnp.float32)
    a_sym = jnp.minimum(a_raw + a_raw.T + jnp.eye(N, dtype=jnp.float32), 1.0)
    adj = a_sym / jnp.sum(a_sym, axis=1, keepdims=True)

    params = init_params(F, hidden=200, seed=0)

    out = hier_global_gcn(x, adj, params)
    out = jax.block_until_ready(out)
    assert out.shape == (N, 200)

    ref_m = reference_mixed(x, adj, params)
    ref_f = reference_f32(x, adj, params)
    assert jnp.allclose(out, ref_m, atol=2e-2, rtol=2e-2), \
        "mismatch vs precision-matched reference"
    assert jnp.allclose(out, ref_f, atol=1e-1, rtol=1e-1), \
        "mismatch vs f32 reference"
    print("KERNEL_OK")
</pallas_src>

<mosaic_0001>
module attributes {stable_mosaic.version = 11 : i64} {
  func.func @_x_prepass_kernel(%arg0: i32, %arg1: memref<128x128xbf16, #tpu.memory_space<vmem>>, %arg2: memref<128x768xbf16, #tpu.memory_space<vmem>>, %arg3: memref<128x256xbf16, #tpu.memory_space<vmem>>, %arg4: memref<128x256xbf16, #tpu.memory_space<vmem>>, %arg5: memref<128x256xbf16, #tpu.memory_space<vmem>>) attributes {dimension_semantics = [#tpu.dimension_semantics<parallel>], iteration_bounds = array<i64: 1>, scalar_prefetch = 0 : i64, scratch_operands = 0 : i64, tpu.core_type = #tpu.core_type<tc>, window_params = [{transform_indices = @transform_0, window_bounds = array<i64: 128, 128>}, {pipeline_mode = #tpu.pipeline_mode<synchronous>, transform_indices = @transform_1, window_bounds = array<i64: 128, 768>}, {transform_indices = @transform_2, window_bounds = array<i64: 128, 256>}, {transform_indices = @transform_3, window_bounds = array<i64: 128, 256>}, {transform_indices = @transform_4, window_bounds = array<i64: 128, 256>}]} {
    %c0 = arith.constant 0 : index
    %c0_0 = arith.constant 0 : index
    %0 = vector.load %arg1[%c0, %c0_0] : memref<128x128xbf16, #tpu.memory_space<vmem>>, vector<128x128xbf16>
    %c0_1 = arith.constant 0 : index
    %c0_2 = arith.constant 0 : index
    %1 = vector.load %arg2[%c0_1, %c0_2] : memref<128x768xbf16, #tpu.memory_space<vmem>>, vector<128x768xbf16>
    %cst = arith.constant dense<0.000000e+00> : vector<128x768xf32>
    %2 = tpu.matmul %0, %1, %cst {dimension_numbers = #tpu.dot_dimension_numbers<[1], [0], [0], [1], [0, 0, 1, 1], [], []>} : vector<128x128xbf16>, vector<128x768xbf16>, vector<128x768xf32> -> vector<128x768xf32>
    %3 = vector.extract_strided_slice %2 {offsets = [0, 0], sizes = [128, 256], strides = [1, 1]} : vector<128x768xf32> to vector<128x256xf32>
    %4 = arith.truncf %3 : vector<128x256xf32> to vector<128x256xbf16>
    %c0_3 = arith.constant 0 : index
    %c0_4 = arith.constant 0 : index
    %5 = vector.load %arg3[%c0_3, %c0_4] : memref<128x256xbf16, #tpu.memory_space<vmem>>, vector<128x256xbf16>
    tpu.vector_store %arg3[%c0_3, %c0_4], %4 {strides = array<i32>} : memref<128x256xbf16, #tpu.memory_space<vmem>>, vector<128x256xbf16>,
    %6 = vector.extract_strided_slice %2 {offsets = [0, 256], sizes = [128, 256], strides = [1, 1]} : vector<128x768xf32> to vector<128x256xf32>
    %7 = arith.truncf %6 : vector<128x256xf32> to vector<128x256xbf16>
    %c0_5 = arith.constant 0 : index
    %c0_6 = arith.constant 0 : index
    %8 = vector.load %arg4[%c0_5, %c0_6] : memref<128x256xbf16, #tpu.memory_space<vmem>>, vector<128x256xbf16>
    tpu.vector_store %arg4[%c0_5, %c0_6], %7 {strides = array<i32>} : memref<128x256xbf16, #tpu.memory_space<vmem>>, vector<128x256xbf16>,
    %9 = vector.extract_strided_slice %2 {offsets = [0, 512], sizes = [128, 256], strides = [1, 1]} : vector<128x768xf32> to vector<128x256xf32>
    %10 = arith.truncf %9 : vector<128x256xf32> to vector<128x256xbf16>
    %c0_7 = arith.constant 0 : index
    %c0_8 = arith.constant 0 : index
    %11 = vector.load %arg5[%c0_7, %c0_8] : memref<128x256xbf16, #tpu.memory_space<vmem>>, vector<128x256xbf16>
    tpu.vector_store %arg5[%c0_7, %c0_8], %10 {strides = array<i32>} : memref<128x256xbf16, #tpu.memory_space<vmem>>, vector<128x256xbf16>,
    return
  }
  func.func @transform_0(%arg0: i32) -> (i32, i32) {
    %c0_i32 = arith.constant 0 : i32
    %c0_i32_0 = arith.constant 0 : i32
    return %arg0, %c0_i32 : i32, i32
  }
  func.func @transform_1(%arg0: i32) -> (i32, i32) {
    %c0_i32 = arith.constant 0 : i32
    %c0_i32_0 = arith.constant 0 : i32
    %c0_i32_1 = arith.constant 0 : i32
    return %c0_i32, %c0_i32_0 : i32, i32
  }
  func.func @transform_2(%arg0: i32) -> (i32, i32) {
    %c0_i32 = arith.constant 0 : i32
    %c0_i32_0 = arith.constant 0 : i32
    return %arg0, %c0_i32 : i32, i32
  }
  func.func @transform_3(%arg0: i32) -> (i32, i32) {
    %c0_i32 = arith.constant 0 : i32
    %c0_i32_0 = arith.constant 0 : i32
    return %arg0, %c0_i32 : i32, i32
  }
  func.func @transform_4(%arg0: i32) -> (i32, i32) {
    %c0_i32 = arith.constant 0 : i32
    %c0_i32_0 = arith.constant 0 : i32
    return %arg0, %c0_i32 : i32, i32
  }
}

</mosaic_0001>

<bundles_post_ra>
// kernel: tpu_custom_call.1
= control target key start
LH: loop header
LB: loop body
LE: loop exit
PB: predicated region body
PF: predicated region fallthrough
CT: control target
= control target key end

     0   :  { %10 = vsyncpa [#allocation3], 0  ;;  %s1661_s0 = inlined_call_operand.hbm [shape: bf16[128,128], index: 0, kind: input, shape index: {}]   ;;  %s1662_s1 = inlined_call_operand.hbm [shape: bf16[128,768], index: 1, kind: input, shape index: {}]   ;;  %s1663_s2 = inlined_call_operand.hbm [shape: bf16[128,256], index: 2, kind: output, shape index: {0}]   ;;  %s1664_s3 = inlined_call_operand.hbm [shape: bf16[128,256], index: 3, kind: output, shape index: {1}]   ;;  %s1665_s4 = inlined_call_operand.hbm [shape: bf16[128,256], index: 4, kind: output, shape index: {2}]  }
   0x1   :  { %11 = vsyncpa [#allocation6], 0 }
   0x2   :  { %12 = vsyncpa [#allocation4], 0 }
   0x3   :  { %13 = vsyncpa [#allocation9], 0  ;;  %s1499_s15 = smov [#allocation2]   ;;  %s1381_s19 = scalar_lea.hbm %s1661_s0, 1024 }
   0x4   :  { %s19_s16 = sshll.u32 %s1499_s15, 4  ;;  %p1382_p0 = scmp.ne.s32.totalorder %s1661_s0, %s1381_s19  ;;  %s20_s16 = int_to_ptr.vmem [resolvable:$true] %s19_s16 }
   0x5   :  { %p1385_p1 = scmp.lt.u32.totalorder %s1381_s19, %s1661_s0 }
   0x7   :  { %p1387_p2 = pnand %p1385_p1, %p1382_p0 }
   0x9   :  { %1390 = shalt.err (!%p1387_p2)
}
   0xa   :  { %s1391_s24 = scalar_lea.vmem %s20_s16, 1024  ;;  %p1396_p4 = scmp.lt.s32.totalorder %s20_s16, %s20_s16 }
   0xb   :  { %p1392_p3 = scmp.ne.s32.totalorder %s20_s16, %s1391_s24  ;;  %p1397_p5 = scmp.lt.s32.totalorder %s1391_s24, %s1391_s24 }
   0xd   :  { %p1398_p6 = por %p1397_p5, %p1396_p4 }
   0xf   :  { %p1399_p7 = pnand %p1398_p6, %p1392_p3 }
  0x11   :  { %1402 = shalt.err (!%p1399_p7)
}
  0x12   :  { %s1500_s25 = smov 64   ;;  %s1501_s26 = smov 4  }
  0x13   :  { %25 = dma.hbm_to_vmem [thread:$0]  %s1661_s0, 1024, %s20_s16, [#allocation3], %s1500_s25, %s1500_s25, %s1501_s26  }
  0x14   :  { %s1502_s29 = smov [#allocation5]   ;;  %s1403_s7 = scalar_lea.hbm %s1662_s1, 6144 }
  0x15   :  { %s31_s30 = sshll.u32 %s1502_s29, 4  ;;  %p1404_p8 = scmp.ne.s32.totalorder %s1662_s1, %s1403_s7  ;;  %s32_s30 = int_to_ptr.vmem [resolvable:$true] %s31_s30 }
  0x16   :  { %p1407_p9 = scmp.lt.u32.totalorder %s1403_s7, %s1662_s1 }
  0x18   :  { %p1409_p10 = pnand %p1407_p9, %p1404_p8 }
  0x1a   :  { %1412 = shalt.err (!%p1409_p10)
}
  0x1b   :  { %s1413_s12 = scalar_lea.vmem %s32_s30, 6144  ;;  %p1418_p12 = scmp.lt.s32.totalorder %s32_s30, %s32_s30 }
  0x1c   :  { %p1414_p11 = scmp.ne.s32.totalorder %s32_s30, %s1413_s12  ;;  %p1419_p13 = scmp.lt.s32.totalorder %s1413_s12, %s1413_s12 }
  0x1e   :  { %p1420_p0 = por %p1419_p13, %p1418_p12 }
  0x20   :  { %p1421_p1 = pnand %p1420_p0, %p1414_p11 }
  0x22   :  { %1424 = shalt.err (!%p1421_p1)
}
  0x23   :  { %s1503_s0 = smov 384   ;;  %s1504_s13 = smov 24  }
  0x24   :  { %37 = dma.hbm_to_vmem [thread:$0]  %s1662_s1, 6144, %s32_s30, [#allocation6], %s1503_s0, %s1503_s0, %s1504_s13  }
  0x25   :  { %1491 = dma.done.wait [#allocation3], 1024  }
  0x26   :  { %1492 = vsyncadd [#allocation3], 4294966272 }
  0x27   :  { %1493 = dma.done.wait [#allocation6], 6144  }
  0x28   :  { %1494 = vsyncadd [#allocation6], 4294961152  ;;  %v1505_v0 = vmov 0   ;;  %v1301_v1 = vld [vmem:[#allocation5 + $0x4] ss:$24 sps:$4 sm:$0xff]   ;;  %v1570_v29 = vld [vmem:[#allocation2 + $0x8] sm:$0xff]  }
  0x29   :  { %429 = vmatprep.mubr.bf16.mxu0 %v1505_v0  ;;  %469 = vmatprep.mubr.bf16.mxu1 %v1505_v0  ;;  %v1303_v2 = vld [vmem:[#allocation5] ss:$24 sps:$4 sm:$0xff]   ;;  %v1304_v3 = vld [vmem:[#allocation5 + $0x34] ss:$24 sps:$4 sm:$0xff]   ;;  %v1306_v4 = vld [vmem:[#allocation5 + $0x30] ss:$24 sps:$4 sm:$0xff]  }
  0x2a   :  { %397 = vmatprep.subr.bf16.mxu0 %v1301_v1  ;;  %1273 = vmatprep.subr.bf16.mxu1 %v1301_v1  ;;  %v1307_v5 = vld [vmem:[#allocation5 + $0x64] ss:$24 sps:$4 sm:$0xff]   ;;  %v1309_v6 = vld [vmem:[#allocation5 + $0x60] ss:$24 sps:$4 sm:$0xff]   ;;  %v1310_v7 = vld [vmem:[#allocation5 + $0x94] ss:$24 sps:$4 sm:$0xff]  }
  0x2b   :  { %398 = vmatpush1.bf16.msra.mxu0 %v1303_v2  ;;  %1281 = vmatpush1.bf16.msra.mxu1 %v1303_v2  ;;  %v1312_v8 = vld [vmem:[#allocation5 + $0x90] ss:$24 sps:$4 sm:$0xff]   ;;  %v1313_v9 = vld [vmem:[#allocation5 + $0xc4] ss:$24 sps:$4 sm:$0xff]   ;;  %v1315_v10 = vld [vmem:[#allocation5 + $0xc0] ss:$24 sps:$4 sm:$0xff]  }
  0x2c   :  { %399 = vmatprep.subr.bf16.mxu0 %v1304_v3  ;;  %1274 = vmatprep.subr.bf16.mxu1 %v1304_v3  ;;  %v1316_v11 = vld [vmem:[#allocation5 + $0xf4] ss:$24 sps:$4 sm:$0xff]   ;;  %v1318_v12 = vld [vmem:[#allocation5 + $0xf0] ss:$24 sps:$4 sm:$0xff]   ;;  %v1319_v13 = vld [vmem:[#allocation5 + $0x124] ss:$24 sps:$4 sm:$0xff]  }
  0x2d   :  { %v1321_v14 = vld [vmem:[#allocation5 + $0x120] ss:$24 sps:$4 sm:$0xff]   ;;  %v1322_v15 = vld [vmem:[#allocation5 + $0x154] ss:$24 sps:$4 sm:$0xff]   ;;  %v1324_v16 = vld [vmem:[#allocation5 + $0x150] ss:$24 sps:$4 sm:$0xff]  }
  0x2e   :  { %v1329_v17 = vld [vmem:[#allocation5 + $0xc] ss:$24 sps:$4 sm:$0xff]   ;;  %v1327_v21 = vld [vmem:[#allocation5 + $0x8] ss:$24 sps:$4 sm:$0xff]   ;;  %v1335_v23 = vld [vmem:[#allocation5 + $0x3c] ss:$24 sps:$4 sm:$0xff]  }
  0x2f   :  { %400 = vmatpush1.bf16.msra.mxu0 %v1306_v4  ;;  %1282 = vmatpush1.bf16.msra.mxu1 %v1306_v4  ;;  %v1332_v18 = vld [vmem:[#allocation5 + $0x14] ss:$24 sps:$4 sm:$0xff]   ;;  %v1562_v19 = vld [vmem:[#allocation2] sm:$0xff]   ;;  %v1330_v22 = vld [vmem:[#allocation5 + $0x10] ss:$24 sps:$4 sm:$0xff]   ;;  %s1506_s1 = smov [#allocation7]  }
  0x30   :  { %401 = vmatprep.subr.bf16.mxu0 %v1307_v5  ;;  %1275 = vmatprep.subr.bf16.mxu1 %v1307_v5  ;;  %v1564_v20 = vld [vmem:[#allocation2 + $0x20] sm:$0xff]   ;;  %v1333_v25 = vld [vmem:[#allocation5 + $0x38] ss:$24 sps:$4 sm:$0xff]   ;;  %v1346_v28 = vld [vmem:[#allocation5 + $0x74] ss:$24 sps:$4 sm:$0xff]   ;;  %s1077_s16 = sshll.u32 %s1506_s1, 4  ;;  %s1078_s16 = int_to_ptr.vmem [resolvable:$true] %s1077_s16 }
  0x31   :  { %v1338_v24 = vld [vmem:[#allocation5 + $0x44] ss:$24 sps:$4 sm:$0xff]   ;;  %v1336_v26 = vld [vmem:[#allocation5 + $0x40] ss:$24 sps:$4 sm:$0xff]   ;;  %v1572_v30 = vld [vmem:[#allocation2 + $0x28] sm:$0xff]   ;;  %s1425_s17 = scalar_lea.vmem %s1078_s16, 2048  ;;  %p1430_p3 = scmp.lt.s32.totalorder %s1078_s16, %s1078_s16 }
  0x32   :  { %v1343_v27 = vld [vmem:[#allocation5 + $0x6c] ss:$24 sps:$4 sm:$0xff]   ;;  %v1341_v31 = vld [vmem:[#allocation5 + $0x68] ss:$24 sps:$4 sm:$0xff]   ;;  %v1349_v33 = vld [vmem:[#allocation5 + $0x9c] ss:$24 sps:$4 sm:$0xff]   ;;  %p1426_p2 = scmp.ne.s32.totalorder %s1078_s16, %s1425_s17  ;;  %p1431_p4 = scmp.lt.s32.totalorder %s1425_s17, %s1425_s17 }
  0x33   :  { %402 = vmatpush1.bf16.msra.mxu0 %v1309_v6  ;;  %1283 = vmatpush1.bf16.msra.mxu1 %v1309_v6  ;;  %v1344_v32 = vld [vmem:[#allocation5 + $0x70] ss:$24 sps:$4 sm:$0xff]   ;;  %v1352_v34 = vld [vmem:[#allocation5 + $0xa4] ss:$24 sps:$4 sm:$0xff]   ;;  %v1350_v36 = vld [vmem:[#allocation5 + $0xa0] ss:$24 sps:$4 sm:$0xff]  }
  0x34   :  { %403 = vmatprep.subr.bf16.mxu0 %v1310_v7  ;;  %1276 = vmatprep.subr.bf16.mxu1 %v1310_v7  ;;  %v1347_v35 = vld [vmem:[#allocation5 + $0x98] ss:$24 sps:$4 sm:$0xff]   ;;  %v1357_v37 = vld [vmem:[#allocation5 + $0xcc] ss:$24 sps:$4 sm:$0xff]   ;;  %v1355_v41 = vld [vmem:[#allocation5 + $0xc8] ss:$24 sps:$4 sm:$0xff]   ;;  %p1432_p5 = por %p1431_p4, %p1430_p3 }
  0x35   :  { %v1360_v38 = vld [vmem:[#allocation5 + $0xd4] ss:$24 sps:$4 sm:$0xff]   ;;  %v1358_v42 = vld [vmem:[#allocation5 + $0xd0] ss:$24 sps:$4 sm:$0xff]   ;;  %v1366_v44 = vld [vmem:[#allocation5 + $0x104] ss:$24 sps:$4 sm:$0xff]  }
  0x36   :  { %v1353_v39 = vld [vmem:[#allocation2 + $0x10] sm:$0xff]   ;;  %v1364_v46 = vld [vmem:[#allocation5 + $0x100] ss:$24 sps:$4 sm:$0xff]   ;;  %v1371_v47 = vld [vmem:[#allocation5 + $0x12c] ss:$24 sps:$4 sm:$0xff]   ;;  %p1433_p6 = pnand %p1432_p5, %p1426_p2 }
  0x37   :  { %404 = vmatpush1.bf16.msra.mxu0 %v1312_v8  ;;  %1284 = vmatpush1.bf16.msra.mxu1 %v1312_v8  ;;  %v1578_v40 = vld [vmem:[#allocation2 + $0x30] sm:$0xff]   ;;  %v1367_v49 = vld [vmem:[#allocation2 + $0x18] sm:$0xff]   ;;  %v1369_v51 = vld [vmem:[#allocation5 + $0x128] ss:$24 sps:$4 sm:$0xff]  }
  0x38   :  { %405 = vmatprep.subr.bf16.mxu0 %v1313_v9  ;;  %1277 = vmatprep.subr.bf16.mxu1 %v1313_v9  ;;  %v1363_v43 = vld [vmem:[#allocation5 + $0xfc] ss:$24 sps:$4 sm:$0xff]   ;;  %v1361_v45 = vld [vmem:[#allocation5 + $0xf8] ss:$24 sps:$4 sm:$0xff]  }
  0x39   :  { %v1374_v48 = vld [vmem:[#allocation5 + $0x134] ss:$24 sps:$4 sm:$0xff]   ;;  %v1368_v50 = vld [vmem:[#allocation2 + $0x38] sm:$0xff]   ;;  %v1372_v52 = vld [vmem:[#allocation5 + $0x130] ss:$24 sps:$4 sm:$0xff]  }
  0x3a   :  { %v1377_v53 = vld [vmem:[#allocation5 + $0x15c] ss:$24 sps:$4 sm:$0xff]   ;;  %v1375_v55 = vld [vmem:[#allocation5 + $0x158] ss:$24 sps:$4 sm:$0xff]  }
  0x3b   :  { %406 = vmatpush1.bf16.msra.mxu0 %v1315_v10  ;;  %1285 = vmatpush1.bf16.msra.mxu1 %v1315_v10  ;;  %v1380_v54 = vld [vmem:[#allocation5 + $0x164] ss:$24 sps:$4 sm:$0xff]   ;;  %v1378_v56 = vld [vmem:[#allocation5 + $0x160] ss:$24 sps:$4 sm:$0xff]  }
  0x3c   :  { %407 = vmatprep.subr.bf16.mxu0 %v1316_v11  ;;  %1278 = vmatprep.subr.bf16.mxu1 %v1316_v11 }
  0x3f   :  { %408 = vmatpush1.bf16.msra.mxu0 %v1318_v12  ;;  %1286 = vmatpush1.bf16.msra.mxu1 %v1318_v12 }
  0x40   :  { %409 = vmatprep.subr.bf16.mxu0 %v1319_v13  ;;  %1279 = vmatprep.subr.bf16.mxu1 %v1319_v13 }
  0x43   :  { %410 = vmatpush1.bf16.msra.mxu0 %v1321_v14  ;;  %1287 = vmatpush1.bf16.msra.mxu1 %v1321_v14 }
  0x44   :  { %411 = vmatprep.subr.bf16.mxu0 %v1322_v15  ;;  %1280 = vmatprep.subr.bf16.mxu1 %v1322_v15 }
  0x47   :  { %412 = vmatpush1.bf16.msra.mxu0 %v1324_v16  ;;  %1288 = vmatpush1.bf16.msra.mxu1 %v1324_v16 }
  0x48   :  { %510 = vmatprep.subr.bf16.mxu1 %v1329_v17  ;;  %623 = vmatprep.subr.bf16.mxu0 %v1332_v18 }
  0x4a   :  { %430 = vmatmul.mubr.bf16.vlgmr.msra.gmra.mrb[0].mxu0 %v1562_v19  ;;  %470 = vmatmul.mubr.bf16.vlgmr.msra.gmra.mrb[0].mxu1 %v1564_v20 }
  0x4b   :  { %511 = vmatpush1.bf16.msra.mxu1 %v1327_v21  ;;  %624 = vmatpush1.bf16.msra.mxu0 %v1330_v22 }
  0x4c   :  { %512 = vmatprep.subr.bf16.mxu1 %v1335_v23  ;;  %625 = vmatprep.subr.bf16.mxu0 %v1338_v24 }
  0x4d   :  { %439 = vmatprep.mubr.bf16.mxu0 %v1505_v0  ;;  %479 = vmatprep.mubr.bf16.mxu1 %v1505_v0 }
  0x4f   :  { %513 = vmatpush1.bf16.msra.mxu1 %v1333_v25  ;;  %626 = vmatpush1.bf16.msra.mxu0 %v1336_v26 }
  0x50   :  { %514 = vmatprep.subr.bf16.mxu1 %v1343_v27  ;;  %627 = vmatprep.subr.bf16.mxu0 %v1346_v28 }
  0x52   :  { %440 = vmatmul.mubr.bf16.gmra.mrb[4].mxu0 %v1570_v29  ;;  %480 = vmatmul.mubr.bf16.gmra.mrb[4].mxu1 %v1572_v30 }
  0x53   :  { %515 = vmatpush1.bf16.msra.mxu1 %v1341_v31  ;;  %628 = vmatpush1.bf16.msra.mxu0 %v1344_v32 }
  0x54   :  { %516 = vmatprep.subr.bf16.mxu1 %v1349_v33  ;;  %629 = vmatprep.subr.bf16.mxu0 %v1352_v34 }
  0x55   :  { %449 = vmatprep.mubr.bf16.mxu0 %v1505_v0  ;;  %489 = vmatprep.mubr.bf16.mxu1 %v1505_v0 }
  0x57   :  { %517 = vmatpush1.bf16.msra.mxu1 %v1347_v35  ;;  %630 = vmatpush1.bf16.msra.mxu0 %v1350_v36 }
  0x58   :  { %518 = vmatprep.subr.bf16.mxu1 %v1357_v37  ;;  %631 = vmatprep.subr.bf16.mxu0 %v1360_v38 }
  0x5a   :  { %450 = vmatmul.mubr.bf16.gmra.mrb[8].mxu0 %v1353_v39  ;;  %490 = vmatmul.mubr.bf16.gmra.mrb[8].mxu1 %v1578_v40 }
  0x5b   :  { %519 = vmatpush1.bf16.msra.mxu1 %v1355_v41  ;;  %632 = vmatpush1.bf16.msra.mxu0 %v1358_v42 }
  0x5c   :  { %520 = vmatprep.subr.bf16.mxu1 %v1363_v43  ;;  %633 = vmatprep.subr.bf16.mxu0 %v1366_v44 }
  0x5d   :  { %459 = vmatprep.mubr.bf16.mxu0 %v1505_v0  ;;  %499 = vmatprep.mubr.bf16.mxu1 %v1505_v0 }
  0x5f   :  { %521 = vmatpush1.bf16.msra.mxu1 %v1361_v45  ;;  %634 = vmatpush1.bf16.msra.mxu0 %v1364_v46 }
  0x60   :  { %522 = vmatprep.subr.bf16.mxu1 %v1371_v47  ;;  %635 = vmatprep.subr.bf16.mxu0 %v1374_v48 }
  0x62   :  { %460 = vmatmul.mubr.bf16.gmra.mrb[12].mxu0 %v1367_v49  ;;  %500 = vmatmul.mubr.bf16.gmra.mrb[12].mxu1 %v1368_v50 }
  0x63   :  { %523 = vmatpush1.bf16.msra.mxu1 %v1369_v51  ;;  %636 = vmatpush1.bf16.msra.mxu0 %v1372_v52 }
  0x64   :  { %524 = vmatprep.subr.bf16.mxu1 %v1377_v53  ;;  %637 = vmatprep.subr.bf16.mxu0 %v1380_v54 }
  0x65   :  { %542 = vmatprep.mubr.bf16.mxu1 %v1505_v0  ;;  %655 = vmatprep.mubr.bf16.mxu0 %v1505_v0 }
  0x67   :  { %525 = vmatpush1.bf16.msra.mxu1 %v1375_v55  ;;  %638 = vmatpush1.bf16.msra.mxu0 %v1378_v56 }
  0x6a   :  { %543 = vmatmul.mubr.bf16.vlgmr.msra.gmra.mrb[16].mxu1 %v1562_v19  ;;  %656 = vmatmul.mubr.bf16.vlgmr.msra.gmra.mrb[16].mxu0 %v1562_v19 }
  0x6b   :  { %552 = vmatprep.mubr.bf16.mxu1 %v1505_v0  ;;  %665 = vmatprep.mubr.bf16.mxu0 %v1505_v0 }
  0x72   :  { %553 = vmatmul.mubr.bf16.gmra.mrb[20].mxu1 %v1570_v29  ;;  %666 = vmatmul.mubr.bf16.gmra.mrb[20].mxu0 %v1570_v29 }
  0x73   :  { %562 = vmatprep.mubr.bf16.mxu1 %v1505_v0  ;;  %675 = vmatprep.mubr.bf16.mxu0 %v1505_v0 }
  0x7a   :  { %563 = vmatmul.mubr.bf16.gmra.mrb[24].mxu1 %v1353_v39  ;;  %676 = vmatmul.mubr.bf16.gmra.mrb[24].mxu0 %v1353_v39 }
  0x7b   :  { %572 = vmatprep.mubr.bf16.mxu1 %v1505_v0  ;;  %685 = vmatprep.mubr.bf16.mxu0 %v1505_v0 }
  0x82   :  { %573 = vmatmul.mubr.bf16.gmra.mrb[28].mxu1 %v1367_v49  ;;  %686 = vmatmul.mubr.bf16.gmra.mrb[28].mxu0 %v1367_v49 }
  0x83   :  { %582 = vmatprep.mubr.bf16.mxu1 %v1505_v0  ;;  %695 = vmatprep.mubr.bf16.mxu0 %v1505_v0 }
  0x8a   :  { %583 = vmatmul.mubr.bf16.gmra.mrb[32].mxu1 %v1564_v20  ;;  %696 = vmatmul.mubr.bf16.gmra.mrb[32].mxu0 %v1564_v20 }
  0x8b   :  { %592 = vmatprep.mubr.bf16.mxu1 %v1505_v0  ;;  %705 = vmatprep.mubr.bf16.mxu0 %v1505_v0 }
  0x92   :  { %593 = vmatmul.mubr.bf16.gmra.mrb[36].mxu1 %v1572_v30  ;;  %706 = vmatmul.mubr.bf16.gmra.mrb[36].mxu0 %v1572_v30 }
  0x93   :  { %602 = vmatprep.mubr.bf16.mxu1 %v1505_v0  ;;  %715 = vmatprep.mubr.bf16.mxu0 %v1505_v0 }
  0x9a   :  { %603 = vmatmul.mubr.bf16.gmra.mrb[40].mxu1 %v1578_v40  ;;  %716 = vmatmul.mubr.bf16.gmra.mrb[40].mxu0 %v1578_v40 }
  0x9b   :  { %612 = vmatprep.mubr.bf16.mxu1 %v1505_v0  ;;  %725 = vmatprep.mubr.bf16.mxu0 %v1505_v0 }
  0xa2   :  { %613 = vmatmul.mubr.bf16.gmra.mrb[44].mxu1 %v1368_v50  ;;  %726 = vmatmul.mubr.bf16.gmra.mrb[44].mxu0 %v1368_v50 }
 0x11d   :  { %v431_v57 = vpop.f32.mrb[0].mxu0  ;;  %v471_v58 = vpop.f32.mrb[0].mxu1 }
 0x11e   :  { %v433_v59 = vpop.f32.mrb[1].mxu0  ;;  %v473_v60 = vpop.f32.mrb[1].mxu1 }
 0x11f   :  { %v1225_v61 = vpack.c.bf16 %v433_v59, %v431_v57  ;;  %v1233_v62 = vpack.c.bf16 %v473_v60, %v471_v58  ;;  %v435_v63 = vpop.f32.mrb[2].mxu0  ;;  %v475_v1 = vpop.f32.mrb[2].mxu1 }
 0x120   :  { %v437_v2 = vpop.f32.mrb[3].mxu0  ;;  %v477_v3 = vpop.f32.mrb[3].mxu1 }
 0x121   :  { %832 = vst [vmem:[#allocation7] sm:$0xff] %v1225_v61  ;;  %840 = vst [vmem:[#allocation7 + $0x40] sm:$0xff] %v1233_v62  ;;  %v1226_v4 = vpack.c.bf16 %v437_v2, %v435_v63  ;;  %v1234_v5 = vpack.c.bf16 %v477_v3, %v475_v1 }
 0x123   :  { %833 = vst [vmem:[#allocation7 + $0x8] sm:$0xff] %v1226_v4  ;;  %841 = vst [vmem:[#allocation7 + $0x48] sm:$0xff] %v1234_v5 }
 0x125   :  { %v441_v6 = vpop.f32.mrb[4].mxu0  ;;  %v481_v0 = vpop.f32.mrb[4].mxu1 }
 0x126   :  { %v443_v7 = vpop.f32.mrb[5].mxu0  ;;  %v483_v8 = vpop.f32.mrb[5].mxu1 }
 0x127   :  { %v1227_v9 = vpack.c.bf16 %v443_v7, %v441_v6  ;;  %v1235_v10 = vpack.c.bf16 %v483_v8, %v481_v0  ;;  %v445_v11 = vpop.f32.mrb[6].mxu0  ;;  %v485_v12 = vpop.f32.mrb[6].mxu1 }
 0x128   :  { %v447_v13 = vpop.f32.mrb[7].mxu0  ;;  %v487_v14 = vpop.f32.mrb[7].mxu1 }
 0x129   :  { %834 = vst [vmem:[#allocation7 + $0x10] sm:$0xff] %v1227_v9  ;;  %842 = vst [vmem:[#allocation7 + $0x50] sm:$0xff] %v1235_v10  ;;  %v1228_v15 = vpack.c.bf16 %v447_v13, %v445_v11  ;;  %v1236_v16 = vpack.c.bf16 %v487_v14, %v485_v12 }
 0x12b   :  { %835 = vst [vmem:[#allocation7 + $0x18] sm:$0xff] %v1228_v15  ;;  %843 = vst [vmem:[#allocation7 + $0x58] sm:$0xff] %v1236_v16 }
 0x12d   :  { %v451_v17 = vpop.f32.mrb[8].mxu0  ;;  %v491_v18 = vpop.f32.mrb[8].mxu1 }
 0x12e   :  { %v453_v19 = vpop.f32.mrb[9].mxu0  ;;  %v493_v20 = vpop.f32.mrb[9].mxu1 }
 0x12f   :  { %v1229_v21 = vpack.c.bf16 %v453_v19, %v451_v17  ;;  %v1237_v22 = vpack.c.bf16 %v493_v20, %v491_v18  ;;  %v455_v23 = vpop.f32.mrb[10].mxu0  ;;  %v495_v24 = vpop.f32.mrb[10].mxu1 }
 0x130   :  { %v457_v25 = vpop.f32.mrb[11].mxu0  ;;  %v497_v26 = vpop.f32.mrb[11].mxu1 }
 0x131   :  { %836 = vst [vmem:[#allocation7 + $0x20] sm:$0xff] %v1229_v21  ;;  %844 = vst [vmem:[#allocation7 + $0x60] sm:$0xff] %v1237_v22  ;;  %v1230_v27 = vpack.c.bf16 %v457_v25, %v455_v23  ;;  %v1238_v28 = vpack.c.bf16 %v497_v26, %v495_v24 }
 0x133   :  { %837 = vst [vmem:[#allocation7 + $0x28] sm:$0xff] %v1230_v27  ;;  %845 = vst [vmem:[#allocation7 + $0x68] sm:$0xff] %v1238_v28 }
 0x135   :  { %v461_v29 = vpop.f32.mrb[12].mxu0  ;;  %v501_v30 = vpop.f32.mrb[12].mxu1 }
 0x136   :  { %v463_v31 = vpop.f32.mrb[13].mxu0  ;;  %v503_v32 = vpop.f32.mrb[13].mxu1 }
 0x137   :  { %v1231_v33 = vpack.c.bf16 %v463_v31, %v461_v29  ;;  %v1239_v34 = vpack.c.bf16 %v503_v32, %v501_v30  ;;  %v465_v35 = vpop.f32.mrb[14].mxu0  ;;  %v505_v36 = vpop.f32.mrb[14].mxu1 }
 0x138   :  { %v467_v37 = vpop.f32.mrb[15].mxu0  ;;  %v507_v38 = vpop.f32.mrb[15].mxu1 }
 0x139   :  { %838 = vst [vmem:[#allocation7 + $0x30] sm:$0xff] %v1231_v33  ;;  %846 = vst [vmem:[#allocation7 + $0x70] sm:$0xff] %v1239_v34  ;;  %v1232_v39 = vpack.c.bf16 %v467_v37, %v465_v35  ;;  %v1240_v40 = vpack.c.bf16 %v507_v38, %v505_v36 }
 0x13b   :  { %839 = vst [vmem:[#allocation7 + $0x38] sm:$0xff] %v1232_v39  ;;  %847 = vst [vmem:[#allocation7 + $0x78] sm:$0xff] %v1240_v40 }
 0x13c   :  { %1436 = shalt.err (!%p1433_p6)
}
 0x13d   :  { %s1437_s20 = scalar_lea.hbm %s1663_s2, 2048 }
 0x13e   :  { %p1438_p7 = scmp.ne.s32.totalorder %s1663_s2, %s1437_s20  ;;  %p1441_p8 = scmp.lt.u32.totalorder %s1437_s20, %s1663_s2 }
 0x140   :  { %p1443_p9 = pnand %p1441_p8, %p1438_p7 }
 0x142   :  { %1446 = shalt.err (!%p1443_p9)
}
 0x143   :  { %s1507_s25 = smov 128   ;;  %s1508_s26 = smov 8   ;;  %v544_v41 = vpop.f32.mrb[16].mxu1  ;;  %v657_v42 = vpop.f32.mrb[16].mxu0 }
 0x144   :  { %1083 = dma.vmem_to_hbm [thread:$0]  %s1078_s16, 2048, %s1663_s2, [#allocation4], %s1507_s25, %s1507_s25, %s1508_s26   ;;  %v546_v43 = vpop.f32.mrb[17].mxu1  ;;  %v659_v44 = vpop.f32.mrb[17].mxu0 }
 0x145   :  { %v1241_v45 = vpack.c.bf16 %v546_v43, %v544_v41  ;;  %v1257_v46 = vpack.c.bf16 %v659_v44, %v657_v42  ;;  %v548_v47 = vpop.f32.mrb[18].mxu1  ;;  %v661_v48 = vpop.f32.mrb[18].mxu0  ;;  %s1509_s2 = smov [#allocation8]   ;;  %s1510_s30 = smov [#allocation10]  }
 0x146   :  { %v550_v49 = vpop.f32.mrb[19].mxu1  ;;  %v663_v50 = vpop.f32.mrb[19].mxu0  ;;  %s1089_s29 = sshll.u32 %s1509_s2, 4  ;;  %s1101_s5 = sshll.u32 %s1510_s30, 4  ;;  %s1090_s29 = int_to_ptr.vmem [resolvable:$true] %s1089_s29  ;;  %s1624_s5 = int_to_ptr.vmem [resolvable:$true] %s1101_s5 }
 0x147   :  { %944 = vst [vmem:[#allocation8] sm:$0xff] %v1241_v45  ;;  %1056 = vst [vmem:[#allocation10] sm:$0xff] %v1257_v46  ;;  %v1242_v51 = vpack.c.bf16 %v550_v49, %v548_v47  ;;  %v1258_v52 = vpack.c.bf16 %v663_v50, %v661_v48  ;;  %v554_v53 = vpop.f32.mrb[20].mxu1  ;;  %v667_v54 = vpop.f32.mrb[20].mxu0  ;;  %s1447_s6 = scalar_lea.vmem %s1090_s29, 2048  ;;  %p1452_p11 = scmp.lt.s32.totalorder %s1090_s29, %s1090_s29 }
 0x148   :  { %v556_v55 = vpop.f32.mrb[21].mxu1  ;;  %v669_v56 = vpop.f32.mrb[21].mxu0  ;;  %p1448_p10 = scmp.ne.s32.totalorder %s1090_s29, %s1447_s6  ;;  %p1453_p12 = scmp.lt.s32.totalorder %s1447_s6, %s1447_s6 }
 0x149   :  { %945 = vst [vmem:[#allocation8 + $0x8] sm:$0xff] %v1242_v51  ;;  %1057 = vst [vmem:[#allocation10 + $0x8] sm:$0xff] %v1258_v52  ;;  %v1243_v57 = vpack.c.bf16 %v556_v55, %v554_v53  ;;  %v1259_v58 = vpack.c.bf16 %v669_v56, %v667_v54  ;;  %v558_v59 = vpop.f32.mrb[22].mxu1  ;;  %v671_v60 = vpop.f32.mrb[22].mxu0 }
 0x14a   :  { %v560_v61 = vpop.f32.mrb[23].mxu1  ;;  %v673_v62 = vpop.f32.mrb[23].mxu0  ;;  %p1454_p13 = por %p1453_p12, %p1452_p11 }
 0x14b   :  { %946 = vst [vmem:[#allocation8 + $0x10] sm:$0xff] %v1243_v57  ;;  %1058 = vst [vmem:[#allocation10 + $0x10] sm:$0xff] %v1259_v58  ;;  %v1244_v63 = vpack.c.bf16 %v560_v61, %v558_v59  ;;  %v1260_v1 = vpack.c.bf16 %v673_v62, %v671_v60 }
 0x14c   :  { %p1455_p0 = pnand %p1454_p13, %p1448_p10 }
 0x14d   :  { %947 = vst [vmem:[#allocation8 + $0x18] sm:$0xff] %v1244_v63  ;;  %1059 = vst [vmem:[#allocation10 + $0x18] sm:$0xff] %v1260_v1  ;;  %v564_v2 = vpop.f32.mrb[24].mxu1  ;;  %v677_v3 = vpop.f32.mrb[24].mxu0 }
 0x14e   :  { %v566_v4 = vpop.f32.mrb[25].mxu1  ;;  %v679_v5 = vpop.f32.mrb[25].mxu0 }
 0x14f   :  { %v1245_v6 = vpack.c.bf16 %v566_v4, %v564_v2  ;;  %v1261_v0 = vpack.c.bf16 %v679_v5, %v677_v3  ;;  %v568_v7 = vpop.f32.mrb[26].mxu1  ;;  %v681_v8 = vpop.f32.mrb[26].mxu0 }
 0x150   :  { %v570_v9 = vpop.f32.mrb[27].mxu1  ;;  %v683_v10 = vpop.f32.mrb[27].mxu0 }
 0x151   :  { %948 = vst [vmem:[#allocation8 + $0x20] sm:$0xff] %v1245_v6  ;;  %1060 = vst [vmem:[#allocation10 + $0x20] sm:$0xff] %v1261_v0  ;;  %v1246_v11 = vpack.c.bf16 %v570_v9, %v568_v7  ;;  %v1262_v12 = vpack.c.bf16 %v683_v10, %v681_v8 }
 0x153   :  { %949 = vst [vmem:[#allocation8 + $0x28] sm:$0xff] %v1246_v11  ;;  %1061 = vst [vmem:[#allocation10 + $0x28] sm:$0xff] %v1262_v12 }
 0x155   :  { %v574_v13 = vpop.f32.mrb[28].mxu1  ;;  %v687_v14 = vpop.f32.mrb[28].mxu0 }
 0x156   :  { %v576_v15 = vpop.f32.mrb[29].mxu1  ;;  %v689_v16 = vpop.f32.mrb[29].mxu0 }
 0x157   :  { %v1247_v17 = vpack.c.bf16 %v576_v15, %v574_v13  ;;  %v1263_v18 = vpack.c.bf16 %v689_v16, %v687_v14  ;;  %v578_v19 = vpop.f32.mrb[30].mxu1  ;;  %v691_v20 = vpop.f32.mrb[30].mxu0 }
 0x158   :  { %v580_v21 = vpop.f32.mrb[31].mxu1  ;;  %v693_v22 = vpop.f32.mrb[31].mxu0 }
 0x159   :  { %950 = vst [vmem:[#allocation8 + $0x30] sm:$0xff] %v1247_v17  ;;  %1062 = vst [vmem:[#allocation10 + $0x30] sm:$0xff] %v1263_v18  ;;  %v1248_v23 = vpack.c.bf16 %v580_v21, %v578_v19  ;;  %v1264_v24 = vpack.c.bf16 %v693_v22, %v691_v20 }
 0x15b   :  { %951 = vst [vmem:[#allocation8 + $0x38] sm:$0xff] %v1248_v23  ;;  %1063 = vst [vmem:[#allocation10 + $0x38] sm:$0xff] %v1264_v24 }
 0x15d   :  { %v584_v25 = vpop.f32.mrb[32].mxu1  ;;  %v697_v26 = vpop.f32.mrb[32].mxu0 }
 0x15e   :  { %v586_v27 = vpop.f32.mrb[33].mxu1  ;;  %v699_v28 = vpop.f32.mrb[33].mxu0 }
 0x15f   :  { %v1249_v29 = vpack.c.bf16 %v586_v27, %v584_v25  ;;  %v1265_v30 = vpack.c.bf16 %v699_v28, %v697_v26  ;;  %v588_v31 = vpop.f32.mrb[34].mxu1  ;;  %v701_v32 = vpop.f32.mrb[34].mxu0 }
 0x160   :  { %v590_v33 = vpop.f32.mrb[35].mxu1  ;;  %v703_v34 = vpop.f32.mrb[35].mxu0 }
 0x161   :  { %952 = vst [vmem:[#allocation8 + $0x40] sm:$0xff] %v1249_v29  ;;  %1064 = vst [vmem:[#allocation10 + $0x40] sm:$0xff] %v1265_v30  ;;  %v1250_v35 = vpack.c.bf16 %v590_v33, %v588_v31  ;;  %v1266_v36 = vpack.c.bf16 %v703_v34, %v701_v32 }
 0x163   :  { %953 = vst [vmem:[#allocation8 + $0x48] sm:$0xff] %v1250_v35  ;;  %1065 = vst [vmem:[#allocation10 + $0x48] sm:$0xff] %v1266_v36 }
 0x165   :  { %v594_v37 = vpop.f32.mrb[36].mxu1  ;;  %v707_v38 = vpop.f32.mrb[36].mxu0 }
 0x166   :  { %v596_v39 = vpop.f32.mrb[37].mxu1  ;;  %v709_v40 = vpop.f32.mrb[37].mxu0 }
 0x167   :  { %v1251_v41 = vpack.c.bf16 %v596_v39, %v594_v37  ;;  %v1267_v42 = vpack.c.bf16 %v709_v40, %v707_v38  ;;  %v598_v43 = vpop.f32.mrb[38].mxu1  ;;  %v711_v44 = vpop.f32.mrb[38].mxu0 }
 0x168   :  { %v600_v45 = vpop.f32.mrb[39].mxu1  ;;  %v713_v46 = vpop.f32.mrb[39].mxu0 }
 0x169   :  { %954 = vst [vmem:[#allocation8 + $0x50] sm:$0xff] %v1251_v41  ;;  %1066 = vst [vmem:[#allocation10 + $0x50] sm:$0xff] %v1267_v42  ;;  %v1252_v47 = vpack.c.bf16 %v600_v45, %v598_v43  ;;  %v1268_v48 = vpack.c.bf16 %v713_v46, %v711_v44 }
 0x16b   :  { %955 = vst [vmem:[#allocation8 + $0x58] sm:$0xff] %v1252_v47  ;;  %1067 = vst [vmem:[#allocation10 + $0x58] sm:$0xff] %v1268_v48 }
 0x16d   :  { %v604_v49 = vpop.f32.mrb[40].mxu1  ;;  %v717_v50 = vpop.f32.mrb[40].mxu0 }
 0x16e   :  { %v606_v51 = vpop.f32.mrb[41].mxu1  ;;  %v719_v52 = vpop.f32.mrb[41].mxu0 }
 0x16f   :  { %v1253_v53 = vpack.c.bf16 %v606_v51, %v604_v49  ;;  %v1269_v54 = vpack.c.bf16 %v719_v52, %v717_v50  ;;  %v608_v55 = vpop.f32.mrb[42].mxu1  ;;  %v721_v56 = vpop.f32.mrb[42].mxu0 }
 0x170   :  { %v610_v57 = vpop.f32.mrb[43].mxu1  ;;  %v723_v58 = vpop.f32.mrb[43].mxu0 }
 0x171   :  { %956 = vst [vmem:[#allocation8 + $0x60] sm:$0xff] %v1253_v53  ;;  %1068 = vst [vmem:[#allocation10 + $0x60] sm:$0xff] %v1269_v54  ;;  %v1254_v59 = vpack.c.bf16 %v610_v57, %v608_v55  ;;  %v1270_v60 = vpack.c.bf16 %v723_v58, %v721_v56 }
 0x173   :  { %957 = vst [vmem:[#allocation8 + $0x68] sm:$0xff] %v1254_v59  ;;  %1069 = vst [vmem:[#allocation10 + $0x68] sm:$0xff] %v1270_v60 }
 0x175   :  { %v614_v61 = vpop.f32.mrb[44].mxu1  ;;  %v727_v62 = vpop.f32.mrb[44].mxu0 }
 0x176   :  { %v616_v63 = vpop.f32.mrb[45].mxu1  ;;  %v729_v1 = vpop.f32.mrb[45].mxu0 }
 0x177   :  { %v1255_v2 = vpack.c.bf16 %v616_v63, %v614_v61  ;;  %v1271_v3 = vpack.c.bf16 %v729_v1, %v727_v62  ;;  %v618_v4 = vpop.f32.mrb[46].mxu1  ;;  %v731_v5 = vpop.f32.mrb[46].mxu0 }
 0x178   :  { %v620_v6 = vpop.f32.mrb[47].mxu1  ;;  %v733_v0 = vpop.f32.mrb[47].mxu0 }
 0x179   :  { %958 = vst [vmem:[#allocation8 + $0x70] sm:$0xff] %v1255_v2  ;;  %1070 = vst [vmem:[#allocation10 + $0x70] sm:$0xff] %v1271_v3  ;;  %v1256_v7 = vpack.c.bf16 %v620_v6, %v618_v4  ;;  %v1272_v8 = vpack.c.bf16 %v733_v0, %v731_v5 }
 0x17b   :  { %959 = vst [vmem:[#allocation8 + $0x78] sm:$0xff] %v1256_v7  ;;  %1071 = vst [vmem:[#allocation10 + $0x78] sm:$0xff] %v1272_v8 }
 0x17c   :  { %1458 = shalt.err (!%p1455_p0)
}
 0x17d   :  { %s1459_s9 = scalar_lea.hbm %s1664_s3, 2048 }
 0x17e   :  { %p1460_p1 = scmp.ne.s32.totalorder %s1664_s3, %s1459_s9  ;;  %p1463_p2 = scmp.lt.u32.totalorder %s1459_s9, %s1664_s3 }
 0x180   :  { %p1465_p3 = pnand %p1463_p2, %p1460_p1 }
 0x182   :  { %1468 = shalt.err (!%p1465_p3)
}
 0x183   :  { %1095 = dma.vmem_to_hbm [thread:$0]  %s1090_s29, 2048, %s1664_s3, [#allocation9], %s1507_s25, %s1507_s25, %s1508_s26  }
 0x184   :  { %s1469_s15 = scalar_lea.vmem %s1624_s5, 2048  ;;  %p1474_p5 = scmp.lt.s32.totalorder %s1624_s5, %s1624_s5 }
 0x185   :  { %p1470_p4 = scmp.ne.s32.totalorder %s1624_s5, %s1469_s15  ;;  %p1475_p6 = scmp.lt.s32.totalorder %s1469_s15, %s1469_s15 }
 0x187   :  { %p1476_p7 = por %p1475_p6, %p1474_p5 }
 0x189   :  { %p1477_p8 = pnand %p1476_p7, %p1470_p4 }
 0x18b   :  { %1480 = shalt.err (!%p1477_p8)
}
 0x18c   :  { %s1481_s17 = scalar_lea.hbm %s1665_s4, 2048 }
 0x18d   :  { %p1482_p9 = scmp.ne.s32.totalorder %s1665_s4, %s1481_s17  ;;  %p1485_p10 = scmp.lt.u32.totalorder %s1481_s17, %s1665_s4 }
 0x18f   :  { %p1487_p11 = pnand %p1485_p10, %p1482_p9 }
 0x191   :  { %1490 = shalt.err (!%p1487_p11)
}
 0x192   :  { %1107 = dma.vmem_to_hbm [thread:$0]  %s1624_s5, 2048, %s1665_s4, [#allocation9], %s1507_s25, %s1507_s25, %s1508_s26  }
 0x193   :  { %1495 = dma.done.wait [#allocation4], 2048  }
 0x194   :  { %1496 = vsyncadd [#allocation4], 4294965248 }
 0x195   :  { %1497 = dma.done.wait [#allocation9], 4096  }
 0x196   :  { %1498 = vsyncadd [#allocation9], 4294963200 }
 0x197   :  { %1117 = vsyncpa [#allocation3], 1 }
 0x198   :  { %1118 = vsyncpa [#allocation6], 1 }
 0x199   :  { %1119 = vsyncpa [#allocation4], 1 }
 0x19a   :  { %1120 = vsyncpa [#allocation9], 1 }

</bundles_post_ra>
